<compile_context>
chip_gen: v6e
topology: v6e:2x2x1
jax: 0.10.0
libtpu: 0.0.40
codegen_flags: <defaults>
</compile_context>

<pallas_src>
import math
import functools

import jax
import jax.numpy as jnp
from jax.experimental import pallas as pl
from jax.experimental.pallas import tpu as pltpu


# ----------------------------------------------------------------------------
# Parameter / buffer setup (plain JAX glue)
# ----------------------------------------------------------------------------
def make_pe(d_model: int, max_len: int) -> jnp.ndarray:
    """Exactly mirrors PositionalEncoding.make_pe -> shape (max_len, 1, d_model)."""
    position = jnp.arange(max_len, dtype=jnp.float32)[:, None]              # (L, 1)
    div_term = jnp.exp(
        jnp.arange(0, d_model, 2, dtype=jnp.float32) * (-math.log(10000.0) / d_model)
    )                                                                        # (D/2,)
    pe = jnp.zeros((max_len, d_model), dtype=jnp.float32)
    pe = pe.at[:, 0::2].set(jnp.sin(position * div_term))
    pe = pe.at[:, 1::2].set(jnp.cos(position * div_term))
    return pe[:, None, :]                                                    # (L, 1, D)


# ----------------------------------------------------------------------------
# Tile selection: derive (ts, tn) from a VMEM budget instead of hardcoding.
# ----------------------------------------------------------------------------
def _choose_tiles(S, N, D, itemsize, n_block_arrays, budget_bytes):
    """Pick (seq_tile, batch_tile) so the per-step blocks (x + out [+ mask]) fit
    `budget_bytes`.  Double-buffering roughly doubles this, so the default
    4 MiB budget stays well inside even v5e's 16 MiB scoped-VMEM default.

    Constraints honored:
      * seq tile is a multiple of 8 or equals S,
      * batch tile * D is a multiple of 128 or the batch tile equals N,
    so the flattened (ts, tn*D) blocks satisfy the (8, 128) tiling rule.
    """
    bytes_per_row_full = N * D * itemsize * n_block_arrays  # one seq row, all batches
    ts, tn = S, N
    if ts * bytes_per_row_full > budget_bytes:
        max_rows = max(1, budget_bytes // bytes_per_row_full)
        if max_rows >= 8:
            ts = (max_rows // 8) * 8
        else:
            ts = min(S, 8)
        if ts * bytes_per_row_full > budget_bytes:
            # Even an 8-row stripe over the full batch is too big -> tile batch too.
            ts = min(S, 8)
            tn_unit = 128 // math.gcd(D, 128)          # keep tn*D % 128 == 0
            bytes_per_batch_col = ts * D * itemsize * n_block_arrays
            max_cols = max(1, budget_bytes // bytes_per_batch_col)
            tn = max(tn_unit, (max_cols // tn_unit) * tn_unit)
            tn = min(tn, N)
    ts = min(ts, S)
    return int(ts), int(tn)


# ----------------------------------------------------------------------------
# Pallas kernels (lane-dense 2-D layout: x/out/mask are (ts, tn*D), pe is (ts, D))
# ----------------------------------------------------------------------------
def _pe_add_kernel(x_ref, pe_ref, o_ref, *, reps):
    pe = pe_ref[...]
    if reps > 1:
        pe = jnp.tile(pe, (1, reps))                     # in-VMEM batch broadcast
    o_ref[...] = (x_ref[...] + pe).astype(o_ref.dtype)


def _pe_add_dropout_kernel(x_ref, pe_ref, mask_ref, o_ref, *, reps):
    # mask is pre-scaled inverted-dropout mask: 0 or 1/(1-p), in x.dtype.
    pe = pe_ref[...]
    if reps > 1:
        pe = jnp.tile(pe, (1, reps))
    y = x_ref[...] + pe
    o_ref[...] = (y * mask_ref[...]).astype(o_ref.dtype)


# ----------------------------------------------------------------------------
# Wrapper
# ----------------------------------------------------------------------------
def positional_encoding_forward(
    x: jnp.ndarray,
    pe: jnp.ndarray,
    *,
    dropout_p: float = 0.1,
    training: bool = False,
    rng_key=None,
    vmem_block_budget_bytes: int = 4 * 1024 * 1024,
) -> jnp.ndarray:
    """Forward pass of PositionalEncoding.

    x:  (S, N, D)
    pe: (max_len, 1, D) float32 buffer (cast to x.dtype internally)
    """
    S, N, D = x.shape
    assert D == pe.shape[2], "d_model mismatch (mirrors the torch assert)"

    use_dropout = training and dropout_p > 0.0
    if use_dropout and dropout_p >= 1.0:
        return jnp.zeros_like(x)

    pe_s = pe[:S, 0, :].astype(x.dtype)                  # (S, D), no f32 penalty for bf16 x
    x2 = x.reshape(S, N * D)                             # lane-dense flat view

    n_block_arrays = 3 if use_dropout else 2             # x + out (+ mask)
    ts, tn = _choose_tiles(S, N, D, x.dtype.itemsize, n_block_arrays,
                           vmem_block_budget_bytes)
    tw = tn * D

    grid = (pl.cdiv(S, ts), pl.cdiv(N, tn))              # batch tiles innermost -> pe block reused
    x_spec = pl.BlockSpec((ts, tw), lambda i, j: (i, j))
    pe_spec = pl.BlockSpec((ts, D), lambda i, j: (i, 0))
    out_spec = pl.BlockSpec((ts, tw), lambda i, j: (i, j))
    out_shape = jax.ShapeDtypeStruct((S, N * D), x.dtype)
    cparams = pltpu.CompilerParams(dimension_semantics=("parallel", "parallel"))

    if not use_dropout:
        # NOTE: a plain `x + pe_s[:, None, :]` XLA fusion is also roofline-bound;
        # the Pallas version is kept so it can later be fused with adjacent ops.
        out2 = pl.pallas_call(
            functools.partial(_pe_add_kernel, reps=tn),
            out_shape=out_shape,
            grid=grid,
            in_specs=[x_spec, pe_spec],
            out_specs=out_spec,
            compiler_params=cparams,
        )(x2, pe_s)
    else:
        if rng_key is None:
            rng_key = jax.random.PRNGKey(0)
        keep = jax.random.bernoulli(rng_key, 1.0 - dropout_p, (S, N * D))
        scale = jnp.asarray(1.0 / (1.0 - dropout_p), dtype=x.dtype)
        mask = keep.astype(x.dtype) * scale              # 0 or 1/(1-p)
        out2 = pl.pallas_call(
            functools.partial(_pe_add_dropout_kernel, reps=tn),
            out_shape=out_shape,
            grid=grid,
            in_specs=[x_spec, pe_spec, x_spec],          # mask shares x's blocking
            out_specs=out_spec,
            compiler_params=cparams,
        )(x2, pe_s, mask)

    return out2.reshape(S, N, D)


# ----------------------------------------------------------------------------
# Demo / correctness check
# ----------------------------------------------------------------------------
if __name__ == "__main__":
    d_model = 32
    max_len = 64
    seq_len = 8
    batch = 2
    p = 0.1

    key = jax.random.PRNGKey(0)
    key_x, key_drop = jax.random.split(key)
    x = jax.random.normal(key_x, (seq_len, batch, d_model), dtype=jnp.float32)

    pe = make_pe(d_model=d_model, max_len=max_len)

    # Eval-mode forward (dropout is identity -> deterministic check).
    out = positional_encoding_forward(x, pe, dropout_p=p, training=False)
    out = jax.block_until_ready(out)

    ref = x + pe[:seq_len].astype(x.dtype)
    assert out.shape == (seq_len, batch, d_model)
    assert out.dtype == x.dtype
    assert jnp.allclose(out, ref, atol=1e-6, rtol=1e-6)

    # Training (dropout) path: every output element must be either 0 (dropped)
    # or (x + pe) * 1/(1-p) (kept).
    out_tr = positional_encoding_forward(
        x, pe, dropout_p=p, training=True, rng_key=key_drop
    )
    out_tr = jax.block_until_ready(out_tr)
    scale = 1.0 / (1.0 - p)
    dropped = jnp.isclose(out_tr, 0.0, atol=1e-6)
    kept_ok = jnp.isclose(out_tr, ref * scale, atol=1e-5, rtol=1e-5)
    assert out_tr.shape == (seq_len, batch, d_model)
    assert bool(jnp.all(dropped | kept_ok))

    print("KERNEL_OK")
</pallas_src>

<mosaic_0001>
module attributes {stable_mosaic.version = 11 : i64} {
  func.func @_pe_add_kernel(%arg0: i32, %arg1: i32, %arg2: memref<8x64xf32, #tpu.memory_space<vmem>>, %arg3: memref<8x32xf32, #tpu.memory_space<vmem>>, %arg4: memref<8x64xf32, #tpu.memory_space<vmem>>) attributes {dimension_semantics = [#tpu.dimension_semantics<parallel>, #tpu.dimension_semantics<parallel>], iteration_bounds = array<i64: 1, 1>, scalar_prefetch = 0 : i64, scratch_operands = 0 : i64, tpu.core_type = #tpu.core_type<tc>, window_params = [{transform_indices = @transform_0, window_bounds = array<i64: 8, 64>}, {transform_indices = @transform_1, window_bounds = array<i64: 8, 32>}, {transform_indices = @transform_2, window_bounds = array<i64: 8, 64>}]} {
    %c0 = arith.constant 0 : index
    %c0_0 = arith.constant 0 : index
    %0 = vector.load %arg3[%c0, %c0_0] : memref<8x32xf32, #tpu.memory_space<vmem>>, vector<8x32xf32>
    %1 = tpu.concatenate %0, %0 in 1 : vector<8x32xf32>, vector<8x32xf32> -> vector<8x64xf32>
    %c0_1 = arith.constant 0 : index
    %c0_2 = arith.constant 0 : index
    %2 = vector.load %arg2[%c0_1, %c0_2] : memref<8x64xf32, #tpu.memory_space<vmem>>, vector<8x64xf32>
    %3 = arith.addf %2, %1 : vector<8x64xf32>
    %c0_3 = arith.constant 0 : index
    %c0_4 = arith.constant 0 : index
    %4 = vector.load %arg4[%c0_3, %c0_4] : memref<8x64xf32, #tpu.memory_space<vmem>>, vector<8x64xf32>
    tpu.vector_store %arg4[%c0_3, %c0_4], %3 {strides = array<i32>} : memref<8x64xf32, #tpu.memory_space<vmem>>, vector<8x64xf32>,
    return
  }
  func.func @transform_0(%arg0: i32, %arg1: i32) -> (i32, i32) {
    %c0_i32 = arith.constant 0 : i32
    return %arg0, %arg1 : i32, i32
  }
  func.func @transform_1(%arg0: i32, %arg1: i32) -> (i32, i32) {
    %c0_i32 = arith.constant 0 : i32
    %c0_i32_0 = arith.constant 0 : i32
    return %arg0, %c0_i32 : i32, i32
  }
  func.func @transform_2(%arg0: i32, %arg1: i32) -> (i32, i32) {
    %c0_i32 = arith.constant 0 : i32
    return %arg0, %arg1 : i32, i32
  }
}

</mosaic_0001>

<bundles_post_ra>
// kernel: tpu_custom_call.1
= control target key start
LH: loop header
LB: loop body
LE: loop exit
PB: predicated region body
PF: predicated region fallthrough
CT: control target
= control target key end

     0   :  { %7 = vsyncpa [#allocation3], 0  ;;  %s161_s0 = inlined_call_operand.hbm [shape: f32[8,64], index: 0, kind: input, shape index: {}]   ;;  %s162_s1 = inlined_call_operand.hbm [shape: f32[8,32], index: 1, kind: input, shape index: {}]   ;;  %s163_s2 = inlined_call_operand.hbm [shape: f32[8,64], index: 2, kind: output, shape index: {}]  }
   0x1   :  { %8 = vsyncpa [#allocation6], 0 }
   0x2   :  { %9 = vsyncpa [#allocation4], 0  ;;  %s133_s9 = smov [#allocation2]   ;;  %s134_s11 = smov [#allocation5]  }
   0x3   :  { %s16_s10 = sshll.u32 %s133_s9, 4  ;;  %s26_s12 = sshll.u32 %s134_s11, 4  ;;  %s17_s10 = int_to_ptr.vmem [resolvable:$true] %s16_s10  ;;  %s27_s12 = int_to_ptr.vmem [resolvable:$true] %s26_s12 }
   0x4   :  { %s75_s13 = scalar_lea.vmem %s17_s10, 128  ;;  %p80_p1 = scmp.lt.s32.totalorder %s17_s10, %s17_s10 }
   0x5   :  { %p76_p0 = scmp.ne.s32.totalorder %s17_s10, %s75_s13  ;;  %p81_p2 = scmp.lt.s32.totalorder %s75_s13, %s75_s13 }
   0x7   :  { %p82_p3 = por %p81_p2, %p80_p1 }
   0x9   :  { %p83_p4 = pnand %p82_p3, %p76_p0 }
   0xb   :  { %86 = shalt.err (!%p83_p4)
}
   0xc   :  { %19 = dma.hbm_to_vmem [thread:$0]  %s161_s0, 128, %s17_s10, [#allocation3]  }
   0xd   :  { %s95_s16 = scalar_lea.vmem %s27_s12, 128  ;;  %p100_p6 = scmp.lt.s32.totalorder %s27_s12, %s27_s12 }
   0xe   :  { %p96_p5 = scmp.ne.s32.totalorder %s27_s12, %s95_s16  ;;  %p101_p7 = scmp.lt.s32.totalorder %s95_s16, %s95_s16 }
  0x10   :  { %p102_p8 = por %p101_p7, %p100_p6 }
  0x12   :  { %p103_p9 = pnand %p102_p8, %p96_p5 }
  0x14   :  { %106 = shalt.err (!%p103_p9)
}
  0x15   :  { %29 = dma.hbm_to_vmem [thread:$0]  %s162_s1, 128, %s27_s12, [#allocation6]  }
  0x16   :  { %127 = dma.done.wait [#allocation3], 128  }
  0x17   :  { %128 = vsyncadd [#allocation3], 4294967168 }
  0x18   :  { %129 = dma.done.wait [#allocation6], 128  }
  0x19   :  { %130 = vsyncadd [#allocation6], 4294967168  ;;  %v36_v0 = vld [vmem:[#allocation5] sm:$0xff]  ;;  %s135_s19 = smov 32   ;;  %vm41_vm0 = vcmask 261120   ;;  %v43_v1 = vld [vmem:[#allocation2] sm:$0xff] }
  0x1a   :  { %38 = vrot.lane.b32.xlu0 %v36_v0, %s135_s19  ;;  %s136_s0 = smov [#allocation7]   ;;  %vm45_vm1 = vcmask 523264  }
  0x1b   :  { %s53_s20 = sshll.u32 %s136_s0, 4  ;;  %s54_s20 = int_to_ptr.vmem [resolvable:$true] %s53_s20 }
  0x1c   :  { %s107_s21 = scalar_lea.vmem %s54_s20, 128  ;;  %p112_p11 = scmp.lt.s32.totalorder %s54_s20, %s54_s20 }
  0x1d   :  { %p108_p10 = scmp.ne.s32.totalorder %s54_s20, %s107_s21  ;;  %p113_p12 = scmp.lt.s32.totalorder %s107_s21, %s107_s21 }
  0x1f   :  { %p114_p13 = por %p113_p12, %p112_p11 }
  0x21   :  { %p115_p0 = pnand %p114_p13, %p108_p10 }
  0x8c   :  { %v39_v2 = vpop.permute.xlu0 %38 }
  0x8d   :  { %v42_v3 = vsel %vm41_vm0, %v36_v0, %v39_v2 }
  0x8e   :  { %v44_v4 = vadd.f32 %v43_v1, %v42_v3 }
  0x90   :  { %46 = vst.msk [vmem:[#allocation7] sm:$0xff] %vm45_vm1, %v44_v4 }
  0x91   :  { %118 = shalt.err (!%p115_p0)
}
  0x92   :  { %56 = dma.vmem_to_hbm [thread:$0]  %s54_s20, 128, %s163_s2, [#allocation4]  }
  0x93   :  { %131 = dma.done.wait [#allocation4], 128  }
  0x94   :  { %132 = vsyncadd [#allocation4], 4294967168 }
  0x95   :  { %60 = vsyncpa [#allocation3], 1 }
  0x96   :  { %61 = vsyncpa [#allocation6], 1 }
  0x97   :  { %62 = vsyncpa [#allocation4], 1 }

</bundles_post_ra>
